<compile_context>
chip_gen: v6e
topology: v6e:2x2x1
jax: 0.10.0
libtpu: 0.0.40
codegen_flags: <defaults>
</compile_context>

<pallas_src>
import jax
import jax.numpy as jnp
from jax.experimental import pallas as pl
from jax.experimental.pallas import tpu as pltpu

# ---- small config consistent with DeepseekV2 MoE ----
T = 8              # num tokens
H = 32             # hidden_size
E = 8              # n_routed_experts
I_R = 16           # moe_intermediate_size
N_SHARED = 1       # n_shared_experts
I_S = I_R * N_SHARED
TOP_K = 2          # num_experts_per_tok
N_GROUP = 4        # n_group
TOPK_GROUP = 2     # topk_group
ROUTED_SCALING = 2.5
RENORMALIZE = True  # norm_topk_prob

TM = 8             # token tile (== T at toy scale; multiple of 8; "parallel" axis)


# ----------------- Pallas kernels -----------------

def gate_kernel(x_ref, wg_ref, out_ref):
    # router logits: (T, H) @ (H, E) -> (T, E), kept in f32 like the module's gate.
    out_ref[...] = jnp.dot(x_ref[...], wg_ref[...],
                           preferred_element_type=jnp.float32)


def fused_moe_kernel(x_ref, w1_ref, w2_ref, ws1_ref, ws2_ref, scale_ref, out_ref):
    """Fused routed-experts (expert dim flattened into lanes) + shared MLP + combine."""
    x = x_ref[...]                                                      # (TM, H) bf16

    # ---- routed experts: one lane-dense gate/up matmul over all experts ----
    gu = jnp.dot(x, w1_ref[...], preferred_element_type=jnp.float32)    # (TM, 2*E*I_R)
    g = gu[:, :E * I_R]                                                  # (TM, E*I_R)
    u = gu[:, E * I_R:]                                                  # (TM, E*I_R)
    # scale_ref already contains routed_scaling_factor * routing weight per lane.
    h = (jax.nn.silu(g) * u * scale_ref[...]).astype(x.dtype)            # (TM, E*I_R) bf16
    routed = jnp.dot(h, w2_ref[...], preferred_element_type=jnp.float32)  # (TM, H)

    # ---- shared experts MLP (CustomDeepseekV2MLP): silu(gate)*up -> down ----
    gus = jnp.dot(x, ws1_ref[...], preferred_element_type=jnp.float32)   # (TM, 2*I_S)
    hs = (jax.nn.silu(gus[:, :I_S]) * gus[:, I_S:]).astype(x.dtype)       # (TM, I_S)
    shared = jnp.dot(hs, ws2_ref[...], preferred_element_type=jnp.float32)  # (TM, H)

    # hidden_states = routed * routed_scaling_factor + shared  (scaling folded into scale_ref)
    out_ref[...] = (routed + shared).astype(out_ref.dtype)


# ----------------- wrappers -----------------

def run_gate(x, wg):
    return pl.pallas_call(
        gate_kernel,
        out_shape=jax.ShapeDtypeStruct((T, E), jnp.float32),
        grid=(1,),
        in_specs=[pl.BlockSpec((T, H), lambda i: (0, 0)),
                  pl.BlockSpec((H, E), lambda i: (0, 0))],
        out_specs=pl.BlockSpec((T, E), lambda i: (0, 0)),
    )(x, wg)


def run_fused_moe(x_bf16, w1_all, w2_all, ws1, ws2, scale_rep):
    n_token_tiles = pl.cdiv(T, TM)
    return pl.pallas_call(
        fused_moe_kernel,
        out_shape=jax.ShapeDtypeStruct((T, H), jnp.float32),
        grid=(n_token_tiles,),
        in_specs=[
            pl.BlockSpec((TM, H), lambda i: (i, 0)),                 # x
            pl.BlockSpec((H, 2 * E * I_R), lambda i: (0, 0)),        # W1_all (gates | ups)
            pl.BlockSpec((E * I_R, H), lambda i: (0, 0)),            # W2_all
            pl.BlockSpec((H, 2 * I_S), lambda i: (0, 0)),            # shared gate_up
            pl.BlockSpec((I_S, H), lambda i: (0, 0)),                # shared down
            pl.BlockSpec((TM, E * I_R), lambda i: (i, 0)),           # scale_rep
        ],
        out_specs=pl.BlockSpec((TM, H), lambda i: (i, 0)),
        compiler_params=pltpu.CompilerParams(
            dimension_semantics=("parallel",)),                      # shards tokens on v7x
    )(x_bf16, w1_all, w2_all, ws1, ws2, scale_rep)


def flatten_expert_weights(w1, w2):
    """w1: (E, H, 2*I_R) -> (H, 2*E*I_R) with all gates first, then all ups
       (expert-major within each half);  w2: (E, I_R, H) -> (E*I_R, H)."""
    w1g = jnp.transpose(w1[:, :, :I_R], (1, 0, 2)).reshape(H, E * I_R)
    w1u = jnp.transpose(w1[:, :, I_R:], (1, 0, 2)).reshape(H, E * I_R)
    w1_all = jnp.concatenate([w1g, w1u], axis=1)
    w2_all = w2.reshape(E * I_R, H)
    return w1_all, w2_all


# ----------------- routing glue (noaux_tc grouped top-k, sigmoid scoring) -----------------
# TODO(synk): grouped top-k stays in plain JAX (lax.top_k has no clean Pallas TPU lowering
# at these tiny shapes); at scale this would become scalar-prefetched gather routing.

def grouped_topk(logits, e_bias):
    scores = jax.nn.sigmoid(logits.astype(jnp.float32))          # scoring_func='sigmoid'
    scores_for_choice = scores + e_bias[None, :]                  # e_score_correction_bias
    group_size = E // N_GROUP
    grp = scores_for_choice.reshape(T, N_GROUP, group_size)
    group_scores = jax.lax.top_k(grp, min(2, group_size))[0].sum(-1)
    group_idx = jax.lax.top_k(group_scores, TOPK_GROUP)[1]        # (T, topk_group)
    group_mask = jnp.zeros((T, N_GROUP), jnp.float32).at[
        jnp.arange(T)[:, None], group_idx].set(1.0)
    score_mask = jnp.repeat(group_mask, group_size, axis=1)       # (T, E)
    masked = jnp.where(score_mask > 0, scores_for_choice, -jnp.inf)
    topk_ids = jax.lax.top_k(masked, TOP_K)[1]
    topk_w = jnp.take_along_axis(scores, topk_ids, axis=1)        # weights from unbiased scores
    if RENORMALIZE:
        topk_w = topk_w / topk_w.sum(-1, keepdims=True)
    return topk_w, topk_ids


# ----------------- reference (pure f32, mirrors the torch module) -----------------

def moe_reference_given_rw(x, rw, w1, w2, wgu_s, wd_s):
    hi = jax.lax.Precision.HIGHEST
    gu = jnp.einsum('th,ehi->eti', x, w1, precision=hi)
    h = jax.nn.silu(gu[..., :I_R]) * gu[..., I_R:]
    o = jnp.einsum('eti,eih->eth', h, w2, precision=hi)            # (E, T, H)
    routed = jnp.einsum('te,eth->th', rw, o, precision=hi)
    gus = jnp.dot(x, wgu_s, precision=hi)
    shared = jnp.dot(jax.nn.silu(gus[:, :I_S]) * gus[:, I_S:], wd_s, precision=hi)
    return routed * ROUTED_SCALING + shared


if __name__ == "__main__":
    key = jax.random.PRNGKey(0)
    keys = jax.random.split(key, 8)
    x = jax.random.normal(keys[0], (T, H), jnp.float32)
    # gate: ReplicatedLinear(H, E, bias=False); torch weight (E, H) -> stored (H, E)
    wg = jax.random.normal(keys[1], (H, E), jnp.float32) * 0.05
    # gate.e_score_correction_bias (E,)
    e_bias = jax.random.normal(keys[2], (E,), jnp.float32) * 0.01
    # routed experts: w13 (E, 2*I_R, H) -> stored (E, H, 2*I_R); w2 (E, H, I_R) -> stored (E, I_R, H)
    w1 = jax.random.normal(keys[3], (E, H, 2 * I_R), jnp.float32) * 0.05
    w2 = jax.random.normal(keys[4], (E, I_R, H), jnp.float32) * 0.05
    # shared experts MLP: gate_up (2*I_S, H) -> (H, 2*I_S); down (H, I_S) -> (I_S, H)
    wgu_s = jax.random.normal(keys[5], (H, 2 * I_S), jnp.float32) * 0.05
    wd_s = jax.random.normal(keys[6], (I_S, H), jnp.float32) * 0.05

    # 1. router logits (Pallas, f32 gate as in the module)
    logits = run_gate(x, wg)

    # 2. noaux_tc grouped top-k routing (plain-JAX glue), dense per-expert weights
    topk_w, topk_ids = grouped_topk(logits, e_bias)
    rw = jnp.zeros((T, E), jnp.float32).at[
        jnp.arange(T)[:, None], topk_ids].add(topk_w)               # (T, E)
    # fold routed_scaling_factor + expand per-expert weight across flattened lanes
    scale_rep = ROUTED_SCALING * jnp.repeat(rw, I_R, axis=1)        # (T, E*I_R) = (8, 128)

    # 3+4. fused shared MLP + flattened routed experts + combine (single Pallas call, bf16 MXU)
    w1_all, w2_all = flatten_expert_weights(w1, w2)
    out = run_fused_moe(
        x.astype(jnp.bfloat16),
        w1_all.astype(jnp.bfloat16),
        w2_all.astype(jnp.bfloat16),
        wgu_s.astype(jnp.bfloat16),
        wd_s.astype(jnp.bfloat16),
        scale_rep,
    )
    out = jax.block_until_ready(out)
    assert out.shape == (T, H)

    # ---- correctness checks ----
    ref_logits = jnp.dot(x, wg, precision=jax.lax.Precision.HIGHEST)
    assert bool(jnp.allclose(logits, ref_logits, rtol=1e-3, atol=1e-3)), "gate mismatch"

    ref = moe_reference_given_rw(x, rw, w1, w2, wgu_s, wd_s)
    # bf16 MXU inputs vs. f32 reference -> relaxed tolerance (errors measured ~2e-4).
    assert bool(jnp.allclose(out, ref, rtol=5e-2, atol=5e-3)), "mismatch vs reference"

    print("KERNEL_OK")
</pallas_src>

<mosaic_0001>
module attributes {stable_mosaic.version = 11 : i64} {
  func.func @gate_kernel(%arg0: i32, %arg1: memref<8x32xf32, #tpu.memory_space<vmem>>, %arg2: memref<32x8xf32, #tpu.memory_space<vmem>>, %arg3: memref<8x8xf32, #tpu.memory_space<vmem>>) attributes {dimension_semantics = [#tpu.dimension_semantics<arbitrary>], iteration_bounds = array<i64: 1>, scalar_prefetch = 0 : i64, scratch_operands = 0 : i64, tpu.core_type = #tpu.core_type<tc>, window_params = [{pipeline_mode = #tpu.pipeline_mode<synchronous>, transform_indices = @transform_0, window_bounds = array<i64: 8, 32>}, {pipeline_mode = #tpu.pipeline_mode<synchronous>, transform_indices = @transform_1, window_bounds = array<i64: 32, 8>}, {pipeline_mode = #tpu.pipeline_mode<synchronous>, transform_indices = @transform_2, window_bounds = array<i64: 8, 8>}]} {
    %c0 = arith.constant 0 : index
    %c0_0 = arith.constant 0 : index
    %0 = vector.load %arg1[%c0, %c0_0] : memref<8x32xf32, #tpu.memory_space<vmem>>, vector<8x32xf32>
    %c0_1 = arith.constant 0 : index
    %c0_2 = arith.constant 0 : index
    %1 = vector.load %arg2[%c0_1, %c0_2] : memref<32x8xf32, #tpu.memory_space<vmem>>, vector<32x8xf32>
    %cst = arith.constant dense<0.000000e+00> : vector<8x8xf32>
    %2 = tpu.matmul %0, %1, %cst {dimension_numbers = #tpu.dot_dimension_numbers<[1], [0], [0], [1], [0, 0, 1, 1], [], []>} : vector<8x32xf32>, vector<32x8xf32>, vector<8x8xf32> -> vector<8x8xf32>
    %c0_3 = arith.constant 0 : index
    %c0_4 = arith.constant 0 : index
    %3 = vector.load %arg3[%c0_3, %c0_4] : memref<8x8xf32, #tpu.memory_space<vmem>>, vector<8x8xf32>
    tpu.vector_store %arg3[%c0_3, %c0_4], %2 {strides = array<i32>} : memref<8x8xf32, #tpu.memory_space<vmem>>, vector<8x8xf32>,
    return
  }
  func.func @transform_0(%arg0: i32) -> (i32, i32) {
    %c0_i32 = arith.constant 0 : i32
    %c0_i32_0 = arith.constant 0 : i32
    %c0_i32_1 = arith.constant 0 : i32
    return %c0_i32, %c0_i32_0 : i32, i32
  }
  func.func @transform_1(%arg0: i32) -> (i32, i32) {
    %c0_i32 = arith.constant 0 : i32
    %c0_i32_0 = arith.constant 0 : i32
    %c0_i32_1 = arith.constant 0 : i32
    return %c0_i32, %c0_i32_0 : i32, i32
  }
  func.func @transform_2(%arg0: i32) -> (i32, i32) {
    %c0_i32 = arith.constant 0 : i32
    %c0_i32_0 = arith.constant 0 : i32
    %c0_i32_1 = arith.constant 0 : i32
    return %c0_i32, %c0_i32_0 : i32, i32
  }
}

</mosaic_0001>

<bundles_post_ra>
// kernel: tpu_custom_call.1
= control target key start
LH: loop header
LB: loop body
LE: loop exit
PB: predicated region body
PF: predicated region fallthrough
CT: control target
= control target key end

     0   :  { %v149_v1 = vmov 0.0   ;;  %vm150_vm0 = vmmov 0   ;;  %s185_s0 = inlined_call_operand.vmem [shape: f32[8,32], index: 0, kind: input, shape index: {}]   ;;  %s186_s1 = inlined_call_operand.vmem [shape: f32[32,8], index: 1, kind: input, shape index: {}]   ;;  %s187_s2 = inlined_call_operand.hbm [shape: f32[8,8], index: 2, kind: output, shape index: {}]  }
   0x1   :  { %v16_v0 = vld [vmem:[%s186_s1 + $0x18] sm:$0xff]  ;;  %113 = vmatprep.subr.mxu0 %v149_v1  ;;  %v15_v2 = vld [vmem:[%s186_s1 + $0x10] sm:$0xff]  ;;  %121 = vmatprep.mubr.msk.f32.mxu0 %vm150_vm0, %v149_v1 }
   0x2   :  { %7 = vsyncpa [#allocation3], 0  ;;  %114 = vmatpush3.msra.mxu0 %v16_v0  ;;  %v14_v3 = vld [vmem:[%s186_s1 + $0x8] sm:$0xff]  ;;  %v13_v4 = vld [vmem:[%s186_s1] sm:$0xff]  ;;  %vm17_vm1 = vcmask 261120   ;;  %s151_s19 = smov [#allocation2]  }
   0x3   :  { %115 = vmatprep.subr.mxu0 %v149_v1  ;;  %v12_v5 = vld [vmem:[%s185_s0] sm:$0xff]  ;;  %s99_s20 = sshll.u32 %s151_s19, 4  ;;  %vm91_vm2 = vcmask 64512   ;;  %s100_s20 = int_to_ptr.vmem [resolvable:$true] %s99_s20 }
   0x4   :  { %116 = vmatpush3.msra.mxu0 %v15_v2  ;;  %s127_s21 = scalar_lea.vmem %s100_s20, 128  ;;  %p132_p1 = scmp.lt.s32.totalorder %s100_s20, %s100_s20 }
   0x5   :  { %117 = vmatprep.subr.mxu0 %v149_v1  ;;  %p128_p0 = scmp.ne.s32.totalorder %s100_s20, %s127_s21  ;;  %p133_p2 = scmp.lt.s32.totalorder %s127_s21, %s127_s21 }
   0x6   :  { %118 = vmatpush3.msra.mxu0 %v14_v3 }
   0x7   :  { %119 = vmatprep.subr.mxu0 %v149_v1  ;;  %p134_p3 = por %p133_p2, %p132_p1 }
   0x8   :  { %120 = vmatpush3.msra.mxu0 %v13_v4 }
   0x9   :  { %122 = vmatmul.mubr.msk.f32.vlgmr.msra.gmra.mxu0 %vm17_vm1, %v12_v5  ;;  %p135_p4 = pnand %p134_p3, %p128_p0 }
  0xc9   :  { %v87_v6 = vpop.f32.mrf.mxu0 }
  0xca   :  { %92 = vst.msk [vmem:[#allocation2] sm:$0xff] %vm91_vm2, %v87_v6 }
  0xcb   :  { %v123_v7 = vpop.f32.mrf.mxu0 }
  0xcc   :  { %138 = shalt.err (!%p135_p4)
}
  0xcd   :  { %102 = dma.vmem_to_hbm [thread:$0]  %s100_s20, 128, %s187_s2, [#allocation3]  }
  0xce   :  { %147 = dma.done.wait [#allocation3], 128  }
  0xcf   :  { %148 = vsyncadd [#allocation3], 4294967168 }
  0xd0   :  { %106 = vsyncpa [#allocation3], 1 }

</bundles_post_ra>
